<compile_context>
chip_gen: v7x
topology: tpu7x:2x2x1
jax: 0.10.0
libtpu: 0.0.40
codegen_flags: <defaults>
</compile_context>

<pallas_src>
import math

import jax
import jax.numpy as jnp
from jax.experimental import pallas as pl
from jax.experimental.pallas import tpu as pltpu

GELU_C = math.sqrt(2.0 / math.pi)


def _round_up(x, m):
    return ((x + m - 1) // m) * m


def phi_mlp_kernel(x_ref, w1_ref, b1_ref, w2_ref, b2_ref, o_ref, acc_ref):
    k = pl.program_id(1)

    # fc1 partial: (tm, H) @ (H, tI) -> f32 on the MXU, then the bias slice.
    h = jnp.dot(x_ref[...], w1_ref[...], preferred_element_type=jnp.float32)
    h = h + b1_ref[...]

    # NewGELU (tanh approximation) in f32 — tanh goes to the otherwise-idle EUP slot.
    g = 0.5 * h * (1.0 + jnp.tanh(GELU_C * (h + 0.044715 * (h * h * h))))

    # fc2 partial: (tm, tI) @ (tI, H) in f32, accumulated across the I tiles.
    partial = jnp.dot(
        g.astype(w2_ref.dtype), w2_ref[...], preferred_element_type=jnp.float32
    )

    @pl.when(k == 0)
    def _():
        acc_ref[...] = partial          # first slice: write, skip zero-init pass

    @pl.when(k > 0)
    def _():
        acc_ref[...] += partial

    @pl.when(k == pl.num_programs(1) - 1)
    def _():
        o_ref[...] = (acc_ref[...] + b2_ref[...]).astype(o_ref.dtype)


def phi_mlp(x, w1, b1, w2, b2, *, tm=256, tI=512, compute_dtype=jnp.bfloat16):
    """x: (..., H).  w1: (H, I), b1: (I,), w2: (I, H), b2: (H,).

    Weights are stored pre-transposed as (in, out) so the kernel computes x @ W + b,
    matching torch.nn.Linear semantics exactly.
    """
    orig_shape = x.shape
    H = orig_shape[-1]
    I = w1.shape[1]

    x2d = x.reshape(-1, H)
    T = x2d.shape[0]

    # Token tile: large (MXU M-dim), multiple of 8 sublanes, clamped to the padded T.
    tm = max(8, min(tm, _round_up(T, 8)))
    T_pad = _round_up(T, tm)
    if T_pad != T:
        x2d = jnp.pad(x2d, ((0, T_pad - T), (0, 0)))

    # Intermediate tile: must divide I; fall back to the full I for small configs.
    tI = min(tI, I)
    if I % tI != 0:
        tI = I

    xk = x2d.astype(compute_dtype)
    w1k = w1.astype(compute_dtype)
    w2k = w2.astype(compute_dtype)
    b1k = b1.reshape(1, I).astype(jnp.float32)
    b2k = b2.reshape(1, H).astype(jnp.float32)

    out = pl.pallas_call(
        phi_mlp_kernel,
        out_shape=jax.ShapeDtypeStruct((T_pad, H), x.dtype),
        grid_spec=pltpu.PrefetchScalarGridSpec(
            num_scalar_prefetch=0,
            grid=(T_pad // tm, I // tI),          # (token tiles, I-reduction tiles)
            in_specs=[
                pl.BlockSpec((tm, H), lambda i, k: (i, 0)),   # x tile (reused over k)
                pl.BlockSpec((H, tI), lambda i, k: (0, k)),   # w1 I-slice
                pl.BlockSpec((1, tI), lambda i, k: (0, k)),   # b1 I-slice
                pl.BlockSpec((tI, H), lambda i, k: (k, 0)),   # w2 I-slice
                pl.BlockSpec((1, H), lambda i, k: (0, 0)),    # b2 (epilogue only)
            ],
            out_specs=pl.BlockSpec((tm, H), lambda i, k: (i, 0)),
            scratch_shapes=[pltpu.VMEM((tm, H), jnp.float32)],
        ),
        compiler_params=pltpu.CompilerParams(
            dimension_semantics=("parallel", "arbitrary"),
            vmem_limit_bytes=48 * 1024 * 1024,   # fits v5e/v6e/v7x with headroom
        ),
    )(xk, w1k, b1k, w2k, b2k)

    if T_pad != T:
        out = out[:T]
    return out.reshape(orig_shape)


def reference_phi_mlp(x, w1, b1, w2, b2):
    h = x @ w1 + b1
    g = 0.5 * h * (1.0 + jnp.tanh(GELU_C * (h + 0.044715 * h**3)))
    return g @ w2 + b2


if __name__ == "__main__":
    # Small shapes consistent with the module: batch=2, seq=8, hidden=32, intermediate=128.
    B, S, H, I = 2, 8, 32, 128

    key = jax.random.PRNGKey(0)
    kx, k1, kb1, k2, kb2 = jax.random.split(key, 5)

    x = jax.random.normal(kx, (B, S, H), dtype=jnp.float32)
    # Deterministic parameter init (Linear-like scaling), stored as (in, out).
    w1 = jax.random.normal(k1, (H, I), dtype=jnp.float32) / math.sqrt(H)
    b1 = jax.random.normal(kb1, (I,), dtype=jnp.float32) * 0.01
    w2 = jax.random.normal(k2, (I, H), dtype=jnp.float32) / math.sqrt(I)
    b2 = jax.random.normal(kb2, (H,), dtype=jnp.float32) * 0.01

    y_ref = reference_phi_mlp(x, w1, b1, w2, b2)

    # Exact-path check (f32 compute) — validates kernel structure / accumulation tightly.
    y_f32 = phi_mlp(x, w1, b1, w2, b2, compute_dtype=jnp.float32)
    y_f32 = jax.block_until_ready(y_f32)
    assert y_f32.shape == (B, S, H)
    assert jnp.allclose(y_f32, y_ref, atol=1e-5, rtol=1e-5), "f32 path mismatch"

    # Fast path: bf16 MXU inputs, f32 accumulation (looser tolerance from bf16 rounding).
    y = phi_mlp(x, w1, b1, w2, b2)  # compute_dtype=bf16 default
    y = jax.block_until_ready(y)
    assert y.shape == (B, S, H)
    assert jnp.allclose(y, y_ref, atol=3e-2, rtol=3e-2), "bf16 path mismatch"

    print("KERNEL_OK")
</pallas_src>

<mosaic_0001>
module attributes {stable_mosaic.version = 11 : i64} {
  func.func @phi_mlp_kernel(%arg0: i32, %arg1: i32, %arg2: memref<16x32xf32, #tpu.memory_space<vmem>>, %arg3: memref<32x128xf32, #tpu.memory_space<vmem>>, %arg4: memref<1x128xf32, #tpu.memory_space<vmem>>, %arg5: memref<128x32xf32, #tpu.memory_space<vmem>>, %arg6: memref<1x32xf32, #tpu.memory_space<vmem>>, %arg7: memref<16x32xf32, #tpu.memory_space<vmem>>, %arg8: memref<16x32xf32, #tpu.memory_space<vmem>>) attributes {dimension_semantics = [#tpu.dimension_semantics<parallel>, #tpu.dimension_semantics<arbitrary>], iteration_bounds = array<i64: 1, 1>, scalar_prefetch = 0 : i64, scratch_operands = 1 : i64, tpu.core_type = #tpu.core_type<tc>, window_params = [{transform_indices = @transform_0, window_bounds = array<i64: 16, 32>}, {transform_indices = @transform_1, window_bounds = array<i64: 32, 128>}, {transform_indices = @transform_2, window_bounds = array<i64: 1, 128>}, {transform_indices = @transform_3, window_bounds = array<i64: 128, 32>}, {pipeline_mode = #tpu.pipeline_mode<synchronous>, transform_indices = @transform_4, window_bounds = array<i64: 1, 32>}, {transform_indices = @transform_5, window_bounds = array<i64: 16, 32>}]} {
    %c0 = arith.constant 0 : index
    %c0_0 = arith.constant 0 : index
    %0 = vector.load %arg2[%c0, %c0_0] : memref<16x32xf32, #tpu.memory_space<vmem>>, vector<16x32xf32>
    %c0_1 = arith.constant 0 : index
    %c0_2 = arith.constant 0 : index
    %1 = vector.load %arg3[%c0_1, %c0_2] : memref<32x128xf32, #tpu.memory_space<vmem>>, vector<32x128xf32>
    %cst = arith.constant dense<0.000000e+00> : vector<16x128xf32>
    %2 = tpu.matmul %0, %1, %cst {dimension_numbers = #tpu.dot_dimension_numbers<[1], [0], [0], [1], [0, 0, 1, 1], [], []>} : vector<16x32xf32>, vector<32x128xf32>, vector<16x128xf32> -> vector<16x128xf32>
    %c0_3 = arith.constant 0 : index
    %c0_4 = arith.constant 0 : index
    %3 = vector.load %arg4[%c0_3, %c0_4] : memref<1x128xf32, #tpu.memory_space<vmem>>, vector<1x128xf32>
    %4 = vector.broadcast %3 : vector<1x128xf32> to vector<16x128xf32>
    %5 = arith.addf %2, %4 : vector<16x128xf32>
    %cst_5 = arith.constant 5.000000e-01 : f32
    %6 = vector.broadcast %cst_5 : f32 to vector<16x128xf32>
    %7 = arith.mulf %6, %5 : vector<16x128xf32>
    %8 = arith.mulf %5, %5 : vector<16x128xf32>
    %9 = arith.mulf %8, %5 : vector<16x128xf32>
    %cst_6 = arith.constant 4.471500e-02 : f32
    %10 = vector.broadcast %cst_6 : f32 to vector<16x128xf32>
    %11 = arith.mulf %10, %9 : vector<16x128xf32>
    %12 = arith.addf %5, %11 : vector<16x128xf32>
    %cst_7 = arith.constant 0.797884583 : f32
    %13 = vector.broadcast %cst_7 : f32 to vector<16x128xf32>
    %14 = arith.mulf %13, %12 : vector<16x128xf32>
    %15 = math.tanh %14 : vector<16x128xf32>
    %cst_8 = arith.constant 1.000000e+00 : f32
    %16 = vector.broadcast %cst_8 : f32 to vector<16x128xf32>
    %17 = arith.addf %16, %15 : vector<16x128xf32>
    %18 = arith.mulf %7, %17 : vector<16x128xf32>
    %c0_9 = arith.constant 0 : index
    %c0_10 = arith.constant 0 : index
    %19 = vector.load %arg5[%c0_9, %c0_10] : memref<128x32xf32, #tpu.memory_space<vmem>>, vector<128x32xf32>
    %cst_11 = arith.constant dense<0.000000e+00> : vector<16x32xf32>
    %20 = tpu.matmul %18, %19, %cst_11 {dimension_numbers = #tpu.dot_dimension_numbers<[1], [0], [0], [1], [0, 0, 1, 1], [], []>} : vector<16x128xf32>, vector<128x32xf32>, vector<16x32xf32> -> vector<16x32xf32>
    %c0_i32 = arith.constant 0 : i32
    %21 = arith.cmpi eq, %arg1, %c0_i32 : i32
    %22 = arith.extui %21 : i1 to i32
    %c0_i32_12 = arith.constant 0 : i32
    %23 = arith.cmpi ne, %22, %c0_i32_12 : i32
    scf.if %23 {
      %c0_17 = arith.constant 0 : index
      %c0_18 = arith.constant 0 : index
      %30 = vector.load %arg8[%c0_17, %c0_18] : memref<16x32xf32, #tpu.memory_space<vmem>>, vector<16x32xf32>
      tpu.vector_store %arg8[%c0_17, %c0_18], %20 {strides = array<i32>} : memref<16x32xf32, #tpu.memory_space<vmem>>, vector<16x32xf32>,
    } else {
    }
    %c0_i32_13 = arith.constant 0 : i32
    %24 = arith.cmpi sgt, %arg1, %c0_i32_13 : i32
    %25 = arith.extui %24 : i1 to i32
    %c0_i32_14 = arith.constant 0 : i32
    %26 = arith.cmpi ne, %25, %c0_i32_14 : i32
    scf.if %26 {
      %c0_17 = arith.constant 0 : index
      %c0_18 = arith.constant 0 : index
      %30 = vector.load %arg8[%c0_17, %c0_18] : memref<16x32xf32, #tpu.memory_space<vmem>>, vector<16x32xf32>
      %31 = arith.addf %30, %20 : vector<16x32xf32>
      %c0_19 = arith.constant 0 : index
      %c0_20 = arith.constant 0 : index
      %32 = vector.load %arg8[%c0_19, %c0_20] : memref<16x32xf32, #tpu.memory_space<vmem>>, vector<16x32xf32>
      tpu.vector_store %arg8[%c0_19, %c0_20], %31 {strides = array<i32>} : memref<16x32xf32, #tpu.memory_space<vmem>>, vector<16x32xf32>,
    } else {
    }
    %c0_i32_15 = arith.constant 0 : i32
    %27 = arith.cmpi eq, %arg1, %c0_i32_15 : i32
    %28 = arith.extui %27 : i1 to i32
    %c0_i32_16 = arith.constant 0 : i32
    %29 = arith.cmpi ne, %28, %c0_i32_16 : i32
    scf.if %29 {
      %c0_17 = arith.constant 0 : index
      %c0_18 = arith.constant 0 : index
      %30 = vector.load %arg8[%c0_17, %c0_18] : memref<16x32xf32, #tpu.memory_space<vmem>>, vector<16x32xf32>
      %c0_19 = arith.constant 0 : index
      %c0_20 = arith.constant 0 : index
      %31 = vector.load %arg6[%c0_19, %c0_20] : memref<1x32xf32, #tpu.memory_space<vmem>>, vector<1x32xf32>
      %32 = vector.broadcast %31 : vector<1x32xf32> to vector<16x32xf32>
      %33 = arith.addf %30, %32 : vector<16x32xf32>
      %c0_21 = arith.constant 0 : index
      %c0_22 = arith.constant 0 : index
      %34 = vector.load %arg7[%c0_21, %c0_22] : memref<16x32xf32, #tpu.memory_space<vmem>>, vector<16x32xf32>
      tpu.vector_store %arg7[%c0_21, %c0_22], %33 {strides = array<i32>} : memref<16x32xf32, #tpu.memory_space<vmem>>, vector<16x32xf32>,
    } else {
    }
    return
  }
  func.func @transform_0(%arg0: i32, %arg1: i32) -> (i32, i32) {
    %c0_i32 = arith.constant 0 : i32
    %c0_i32_0 = arith.constant 0 : i32
    return %arg0, %c0_i32 : i32, i32
  }
  func.func @transform_1(%arg0: i32, %arg1: i32) -> (i32, i32) {
    %c0_i32 = arith.constant 0 : i32
    %c0_i32_0 = arith.constant 0 : i32
    return %c0_i32, %arg1 : i32, i32
  }
  func.func @transform_2(%arg0: i32, %arg1: i32) -> (i32, i32) {
    %c0_i32 = arith.constant 0 : i32
    %c0_i32_0 = arith.constant 0 : i32
    return %c0_i32, %arg1 : i32, i32
  }
  func.func @transform_3(%arg0: i32, %arg1: i32) -> (i32, i32) {
    %c0_i32 = arith.constant 0 : i32
    %c0_i32_0 = arith.constant 0 : i32
    return %arg1, %c0_i32 : i32, i32
  }
  func.func @transform_4(%arg0: i32, %arg1: i32) -> (i32, i32) {
    %c0_i32 = arith.constant 0 : i32
    %c0_i32_0 = arith.constant 0 : i32
    %c0_i32_1 = arith.constant 0 : i32
    return %c0_i32, %c0_i32_0 : i32, i32
  }
  func.func @transform_5(%arg0: i32, %arg1: i32) -> (i32, i32) {
    %c0_i32 = arith.constant 0 : i32
    %c0_i32_0 = arith.constant 0 : i32
    return %arg0, %c0_i32 : i32, i32
  }
}

</mosaic_0001>

<bundles_post_ra>
// kernel: tpu_custom_call.1
= control target key start
LH: loop header
LB: loop body
LE: loop exit
PB: predicated region body
PF: predicated region fallthrough
CT: control target
= control target key end

     0   :  { %vm34_vm0 = vcmask 261120   ;;  %s541_s0 = inlined_call_operand.vmem [shape: f32[16,32], index: 0, kind: input, shape index: {}]   ;;  %s542_s1 = inlined_call_operand.vmem [shape: f32[32,128], index: 1, kind: input, shape index: {}]   ;;  %s543_s2 = inlined_call_operand.vmem [shape: f32[1,128], index: 2, kind: input, shape index: {}]   ;;  %s544_s3 = inlined_call_operand.vmem [shape: f32[128,32], index: 3, kind: input, shape index: {}]   ;;  %s545_s4 = inlined_call_operand.vmem [shape: f32[1,32], index: 4, kind: input, shape index: {}]   ;;  %s546_s5 = inlined_call_operand.hbm [shape: f32[16,32], index: 5, kind: output, shape index: {}]  }
   0x1   :  { %v23_v0 = vld [vmem:[%s542_s1] sm:$0xff]  ;;  %v24_v1 = vld [vmem:[%s542_s1 + $0x8] sm:$0xff]  ;;  %v25_v2 = vld [vmem:[%s542_s1 + $0x10] sm:$0xff] }
   0x2   :  { %v347_v3 = vpack.c.bf16 %v24_v1, %v23_v0  ;;  %v26_v4 = vld [vmem:[%s542_s1 + $0x18] sm:$0xff]  ;;  %v21_v5 = vld [vmem:[%s541_s0] sm:$0xff]  ;;  %v135_v8 = vld [vmem:[%s544_s3 + $0x8] sm:$0xff] }
   0x3   :  { %v351_v6 = vpack.c.bf16 %v26_v4, %v25_v2  ;;  %309 = vmatprep.mubr.msk.f32.mxu0 %vm34_vm0, %v21_v5  ;;  %v134_v7 = vld [vmem:[%s544_s3] sm:$0xff] }
   0x4   :  { %10 = vsyncpa [#allocation4], 0  ;;  %348 = vmatprep.subr.bf16.mxu0 %v347_v3  ;;  %v355_v9 = vpack.c.bf16 %v135_v8, %v134_v7  ;;  %v22_v10 = vld [vmem:[%s541_s0 + $0x8] sm:$0xff]  ;;  %v136_v11 = vld [vmem:[%s544_s3 + $0x10] sm:$0xff]  ;;  %s418_s11 = smov [#allocation3]  }
   0x5   :  { %350 = vmatpush3.bf16.msra.mxu0 %v347_v3  ;;  %v137_v12 = vld [vmem:[%s544_s3 + $0x18] sm:$0xff]  ;;  %v138_v14 = vld [vmem:[%s544_s3 + $0x20] sm:$0xff]  ;;  %v139_v15 = vld [vmem:[%s544_s3 + $0x28] sm:$0xff]  ;;  %s262_s12 = sshll.u32 %s418_s11, 4  ;;  %s263_s12 = int_to_ptr.vmem [resolvable:$true] %s262_s12 }
   0x6   :  { %352 = vmatprep.subr.bf16.mxu0 %v351_v6  ;;  %356 = vmatprep.subr.bf16.mxu1 %v355_v9  ;;  %v359_v13 = vpack.c.bf16 %v137_v12, %v136_v11  ;;  %v363_v16 = vpack.c.bf16 %v139_v15, %v138_v14  ;;  %v140_v17 = vld [vmem:[%s544_s3 + $0x30] sm:$0xff]  ;;  %v141_v18 = vld [vmem:[%s544_s3 + $0x38] sm:$0xff]  ;;  %v142_v20 = vld [vmem:[%s544_s3 + $0x40] sm:$0xff]  ;;  %s394_s13 = scalar_lea.vmem %s263_s12, 256  ;;  %p399_p1 = scmp.lt.s32.totalorder %s263_s12, %s263_s12 }
   0x7   :  { %358 = vmatpush3.bf16.msra.mxu1 %v355_v9  ;;  %v367_v19 = vpack.c.bf16 %v141_v18, %v140_v17  ;;  %v143_v21 = vld [vmem:[%s544_s3 + $0x48] sm:$0xff]  ;;  %v144_v22 = vld [vmem:[%s544_s3 + $0x50] sm:$0xff]  ;;  %v145_v24 = vld [vmem:[%s544_s3 + $0x58] sm:$0xff]  ;;  %p395_p0 = scmp.ne.s32.totalorder %s263_s12, %s394_s13  ;;  %p400_p2 = scmp.lt.s32.totalorder %s394_s13, %s394_s13 }
   0x8   :  { %360 = vmatprep.subr.bf16.mxu1 %v359_v13  ;;  %v371_v23 = vpack.c.bf16 %v143_v21, %v142_v20  ;;  %v375_v25 = vpack.c.bf16 %v145_v24, %v144_v22  ;;  %v146_v26 = vld [vmem:[%s544_s3 + $0x60] sm:$0xff]  ;;  %v147_v27 = vld [vmem:[%s544_s3 + $0x68] sm:$0xff]  ;;  %v148_v29 = vld [vmem:[%s544_s3 + $0x70] sm:$0xff] }
   0x9   :  { %354 = vmatpush3.bf16.msra.mxu0 %v351_v6  ;;  %v379_v28 = vpack.c.bf16 %v147_v27, %v146_v26  ;;  %v149_v30 = vld [vmem:[%s544_s3 + $0x78] sm:$0xff]  ;;  %v273_v32 = vld [vmem:[%s543_s2] ss:$0 sm:$0xff]  ;;  %p401_p3 = por %p400_p2, %p399_p1 }
   0xa   :  { %v383_v31 = vpack.c.bf16 %v149_v30, %v148_v29  ;;  %v276_v57 = vld [vmem:[%s545_s4] ss:$0 sm:$0xff] }
   0xb   :  { %362 = vmatpush3.bf16.msra.mxu1 %v359_v13  ;;  %p402_p4 = pnand %p401_p3, %p395_p0 }
   0xc   :  { %310 = vmatmul.mubr.msk.f32.vlgmr.msra.gmra.mrb[0].mxu0 %vm34_vm0, %v22_v10  ;;  %364 = vmatprep.subr.bf16.mxu1 %v363_v16 }
   0xf   :  { %366 = vmatpush3.bf16.msra.mxu1 %v363_v16 }
  0x10   :  { %368 = vmatprep.subr.bf16.mxu1 %v367_v19 }
  0x13   :  { %370 = vmatpush3.bf16.msra.mxu1 %v367_v19 }
  0x14   :  { %372 = vmatprep.subr.bf16.mxu1 %v371_v23 }
  0x17   :  { %374 = vmatpush3.bf16.msra.mxu1 %v371_v23 }
  0x18   :  { %376 = vmatprep.subr.bf16.mxu1 %v375_v25 }
  0x1b   :  { %378 = vmatpush3.bf16.msra.mxu1 %v375_v25 }
  0x1c   :  { %380 = vmatprep.subr.bf16.mxu1 %v379_v28 }
  0x1f   :  { %382 = vmatpush3.bf16.msra.mxu1 %v379_v28 }
  0x20   :  { %384 = vmatprep.subr.bf16.mxu1 %v383_v31 }
  0x23   :  { %386 = vmatpush3.bf16.msra.mxu1 %v383_v31 }
  0xdf   :  { %v311_v33 = vpop.f32.mrb[0].mxu0 }
  0xe0   :  { %v113_v34 = vadd.f32 %v311_v33, %v273_v32  ;;  %v107_v35 = vpop.f32.mrb[1].mxu0 }
  0xe1   :  { %v108_v36 = vadd.f32 %v273_v32, %v107_v35 }
  0xe2   :  { %v119_v37 = vmul.f32 %v113_v34, %v113_v34  ;;  %v117_v52 = vmul.f32 0.5, %v113_v34 }
  0xe3   :  { %v118_v38 = vmul.f32 %v108_v36, %v108_v36  ;;  %v116_v50 = vmul.f32 0.5, %v108_v36 }
  0xe4   :  { %v121_v39 = vmul.f32 %v119_v37, %v113_v34 }
  0xe5   :  { %v120_v40 = vmul.f32 %v118_v38, %v108_v36 }
  0xe6   :  { %v123_v41 = vmul.f32 0.044715, %v121_v39 }
  0xe7   :  { %v122_v42 = vmul.f32 0.044715, %v120_v40 }
  0xe8   :  { %v125_v43 = vadd.f32 %v123_v41, %v113_v34 }
  0xe9   :  { %v124_v44 = vadd.f32 %v122_v42, %v108_v36 }
  0xea   :  { %v127_v45 = vmul.f32 0.7978846, %v125_v43 }
  0xeb   :  { %v126_v46 = vmul.f32 0.7978846, %v124_v44 }
  0xec   :  { %390 = vtanh.f32 %v127_v45 }
  0xed   :  { %392 = vtanh.f32 %v126_v46 }
  0xf6   :  { %v391_v47 = vpop.eup %390 }
  0xf7   :  { %v393_v48 = vpop.eup %392  ;;  %v131_v49 = vadd.f32 1.0, %v391_v47 }
  0xf8   :  { %v130_v51 = vadd.f32 1.0, %v393_v48 }
  0xf9   :  { %v133_v54 = vmul.f32 %v131_v49, %v117_v52 }
  0xfa   :  { %v132_v53 = vmul.f32 %v130_v51, %v116_v50 }
  0xfc   :  { %344 = vmatprep.mubr.f32.mxu1 %v132_v53 }
  0xfd   :  { %345 = vmatmul.mubr.f32.vlgmr.msra.gmra.mrb[0].mxu1 %v133_v54 }
 0x1d0   :  { %v346_v55 = vpop.f32.mrb[0].mxu1 }
 0x1d1   :  { %230 = vst.msk [vmem:[#allocation2 + $0x8] sm:$0xff] %vm34_vm0, %v346_v55  ;;  %v216_v56 = vpop.f32.mrb[1].mxu1 }
 0x1d2   :  { %229 = vst.msk [vmem:[#allocation2] sm:$0xff] %vm34_vm0, %v216_v56 }
 0x1d8   :  { %v245_v58 = vld [vmem:[#allocation2 + $0x8] sm:$0xff] }
 0x1d9   :  { %v244_v59 = vld [vmem:[#allocation2] sm:$0xff]  ;;  %v254_v60 = vadd.f32 %v276_v57, %v245_v58 }
 0x1da   :  { %v253_v61 = vadd.f32 %v276_v57, %v244_v59 }
 0x1db   :  { %256 = vst.msk [vmem:[#allocation3 + $0x8] sm:$0xff] %vm34_vm0, %v254_v60 }
 0x1dc   :  { %255 = vst.msk [vmem:[#allocation3] sm:$0xff] %vm34_vm0, %v253_v61 }
 0x1dd   :  { %405 = shalt.err (!%p402_p4)
}
 0x1de   :  { %s406_s15 = scalar_lea.hbm %s546_s5, 256 }
 0x1df   :  { %p407_p5 = scmp.ne.s32.totalorder %s546_s5, %s406_s15  ;;  %p410_p6 = scmp.lt.u32.totalorder %s406_s15, %s546_s5 }
 0x1e1   :  { %p412_p7 = pnand %p410_p6, %p407_p5 }
 0x1e3   :  { %415 = shalt.err (!%p412_p7)
}
 0x1e4   :  { %s419_s19 = smov 128   ;;  %s420_s20 = smov 8  }
 0x1e5   :  { %268 = dma.vmem_to_hbm [thread:$0]  %s263_s12, 256, %s546_s5, [#allocation4], %s419_s19, %s419_s19, %s420_s20  }
 0x1e6   :  { %416 = dma.done.wait [#allocation4], 256  }
 0x1e7   :  { %417 = vsyncadd [#allocation4], 4294967040 }
 0x1e8   :  { %272 = vsyncpa [#allocation4], 1 }

</bundles_post_ra>
